<compile_context>
chip_gen: v7x
topology: tpu7x:2x2x1
jax: 0.10.0
libtpu: 0.0.40
codegen_flags: <defaults>
</compile_context>

<pallas_src>
import functools

import jax
import jax.numpy as jnp
from jax import lax
from jax.experimental import pallas as pl
from jax.experimental.pallas import tpu as pltpu


def _spatial_transformer_kernel(base_ref, flow_ref, src_ref, out_ref, *, H, W, C, TN):
    f32 = jnp.float32

    base = base_ref[...].astype(f32)        # (2, TN) identity grid slice (row, col)
    flow = flow_ref[0].astype(f32)          # (2, TN) displacement (dH, dW)

    # new_locs = grid + flow, normalized to [-1, 1] exactly as the PyTorch
    # module does, then un-normalized the way grid_sample(align_corners=False)
    # does.  Two-step form kept so rounding matches the reference.
    loc = base + flow
    y_norm = 2.0 * (loc[0:1, :] / (H - 1) - 0.5)
    x_norm = 2.0 * (loc[1:2, :] / (W - 1) - 0.5)
    iy = ((y_norm + 1.0) * H - 1.0) * 0.5   # (1, TN) row sample coordinate
    ix = ((x_norm + 1.0) * W - 1.0) * 0.5   # (1, TN) col sample coordinate

    y0f = jnp.floor(iy)
    x0f = jnp.floor(ix)
    wy1 = iy - y0f
    wx1 = ix - x0f
    wy0 = 1.0 - wy1
    wx0 = 1.0 - wx1
    y0 = y0f.astype(jnp.int32)
    x0 = x0f.astype(jnp.int32)
    y1 = y0 + 1
    x1 = x0 + 1

    # Small one-hot weight matrices; OOB corners (zero padding) contribute
    # nothing because their index never matches any row.
    h_iota = lax.broadcasted_iota(jnp.int32, (H, TN), 0)
    w_iota = lax.broadcasted_iota(jnp.int32, (W, TN), 0)
    ry = (jnp.where(h_iota == y0, wy0, 0.0) +
          jnp.where(h_iota == y1, wy1, 0.0))                      # (H, TN)
    cx = (jnp.where(w_iota == x0, wx0, 0.0) +
          jnp.where(w_iota == x1, wx1, 0.0))                      # (W, TN)

    # Stage 1 (MXU): row interpolation.  src is pre-laid-out as (C*W, H) so
    # the systolic M dimension is C*W instead of C.
    src_cwh = src_ref[0].astype(f32)                              # (C*W, H)
    t = jnp.dot(src_cwh, ry, preferred_element_type=jnp.float32)  # (C*W, TN)

    # Stage 2 (VPU): column interpolation -- Cx-weighted reduction over W.
    out = jnp.sum(t.reshape(C, W, TN) * cx[None, :, :], axis=1)   # (C, TN)
    out_ref[...] = out[None].astype(out_ref.dtype)


def spatial_transformer(src, flow, *, tn=None):
    """Pallas equivalent of SpatialTransformer(size=(H, W), mode='bilinear')."""
    N, C, H, W = src.shape
    assert flow.shape == (N, 2, H, W)
    assert H > 1 and W > 1, "H == 1 or W == 1 divides by zero (mirrors PyTorch)"
    HW = H * W

    # Output-pixel tile: lane-dense multiple of 128, capped at 512 so the
    # per-step working set stays far below v7x's 64 MiB VMEM.
    if tn is None:
        tn = min(512, -(-HW // 128) * 128)
        # With a single batch element, make sure there are >= 2 parallel grid
        # steps so both v7x TensorCores (and the pipeline) get work.
        if N * (-(-HW // tn)) < 2 and tn % 256 == 0:
            tn //= 2
    assert tn % 128 == 0
    hw_pad = -(-HW // tn) * tn
    num_j = hw_pad // tn

    # Identity grid (torch.meshgrid 'ij'): pixel p -> (row = p // W, col = p % W),
    # computed once here instead of per grid step inside the kernel.
    p = jnp.arange(HW, dtype=jnp.int32)
    base = jnp.stack([(p // W).astype(jnp.float32),
                      (p % W).astype(jnp.float32)], axis=0)        # (2, HW)

    flow_f = flow.reshape(N, 2, HW)
    if hw_pad != HW:  # keep the output lane axis dense / 128-aligned
        pad = hw_pad - HW
        base = jnp.pad(base, ((0, 0), (0, pad)))
        flow_f = jnp.pad(flow_f, ((0, 0), (0, 0), (0, pad)))

    # Layout plumbing (one-time XLA transpose): (N, C, H, W) -> (N, C*W, H)
    # so stage 1 contracts over H with C*W rows feeding the MXU.
    src_cwh = jnp.transpose(src, (0, 1, 3, 2)).reshape(N, C * W, H)

    kernel = functools.partial(_spatial_transformer_kernel, H=H, W=W, C=C, TN=tn)
    out = pl.pallas_call(
        kernel,
        out_shape=jax.ShapeDtypeStruct((N, C, hw_pad), src.dtype),
        grid_spec=pltpu.PrefetchScalarGridSpec(
            num_scalar_prefetch=0,
            grid=(N, num_j),
            in_specs=[
                pl.BlockSpec((2, tn), lambda n, j: (0, j)),            # identity grid
                pl.BlockSpec((1, 2, tn), lambda n, j: (n, 0, j)),      # flow tile
                pl.BlockSpec((1, C * W, H), lambda n, j: (n, 0, 0)),   # src, resident per n
            ],
            out_specs=pl.BlockSpec((1, C, tn), lambda n, j: (n, 0, j)),
        ),
        compiler_params=pltpu.CompilerParams(
            dimension_semantics=("parallel", "parallel")),
    )(base, flow_f, src_cwh)
    return out[:, :, :HW].reshape(N, C, H, W)


def _reference(src, flow):
    """Pure-JAX reference reproducing the PyTorch forward (bilinear, zeros, align_corners=False)."""
    N, C, H, W = src.shape
    row = jnp.arange(H, dtype=jnp.float32)[:, None]
    col = jnp.arange(W, dtype=jnp.float32)[None, :]
    y_idx = row + flow[:, 0]
    x_idx = col + flow[:, 1]
    y_norm = 2.0 * (y_idx / (H - 1) - 0.5)
    x_norm = 2.0 * (x_idx / (W - 1) - 0.5)
    iy = ((y_norm + 1.0) * H - 1.0) * 0.5
    ix = ((x_norm + 1.0) * W - 1.0) * 0.5
    y0 = jnp.floor(iy)
    x0 = jnp.floor(ix)
    y1, x1 = y0 + 1, x0 + 1
    wy1, wx1 = iy - y0, ix - x0
    wy0, wx0 = 1.0 - wy1, 1.0 - wx1
    src_flat = src.reshape(N, C, H * W)

    def gather(yc, xc):
        valid = (yc >= 0) & (yc <= H - 1) & (xc >= 0) & (xc <= W - 1)
        yci = jnp.clip(yc, 0, H - 1).astype(jnp.int32)
        xci = jnp.clip(xc, 0, W - 1).astype(jnp.int32)
        flat = (yci * W + xci).reshape(N, 1, H * W)
        g = jnp.take_along_axis(src_flat, flat, axis=2).reshape(N, C, H, W)
        return jnp.where(valid[:, None], g, 0.0)

    return (wy0[:, None] * wx0[:, None] * gather(y0, x0) +
            wy0[:, None] * wx1[:, None] * gather(y0, x1) +
            wy1[:, None] * wx0[:, None] * gather(y1, x0) +
            wy1[:, None] * wx1[:, None] * gather(y1, x1))


if __name__ == "__main__":
    key = jax.random.PRNGKey(0)
    k1, k2 = jax.random.split(key)
    N, C, H, W = 2, 4, 16, 16
    src = jax.random.normal(k1, (N, C, H, W), dtype=jnp.float32)
    flow = 3.0 * jax.random.normal(k2, (N, 2, H, W), dtype=jnp.float32)

    out = jax.block_until_ready(spatial_transformer(src, flow))
    ref = jax.block_until_ready(_reference(src, flow))

    assert out.shape == (N, C, H, W)
    assert jnp.allclose(out, ref, atol=1e-5, rtol=1e-5), (
        f"max abs err = {jnp.max(jnp.abs(out - ref))}")
    print("KERNEL_OK")
</pallas_src>

<mosaic_0001>
module attributes {stable_mosaic.version = 11 : i64} {
  func.func @_spatial_transformer_kernel(%arg0: i32, %arg1: i32, %arg2: memref<2x256xf32, #tpu.memory_space<vmem>>, %arg3: memref<1x2x256xf32, #tpu.memory_space<vmem>>, %arg4: memref<1x64x16xf32, #tpu.memory_space<vmem>>, %arg5: memref<1x4x256xf32, #tpu.memory_space<vmem>>) attributes {dimension_semantics = [#tpu.dimension_semantics<parallel>, #tpu.dimension_semantics<parallel>], iteration_bounds = array<i64: 2, 1>, scalar_prefetch = 0 : i64, scratch_operands = 0 : i64, tpu.core_type = #tpu.core_type<tc>, window_params = [{transform_indices = @transform_0, window_bounds = array<i64: 2, 256>}, {transform_indices = @transform_1, window_bounds = array<i64: 1, 2, 256>}, {transform_indices = @transform_2, window_bounds = array<i64: 1, 64, 16>}, {transform_indices = @transform_3, window_bounds = array<i64: 1, 4, 256>}]} {
    %c0 = arith.constant 0 : index
    %c0_0 = arith.constant 0 : index
    %0 = vector.load %arg2[%c0, %c0_0] : memref<2x256xf32, #tpu.memory_space<vmem>>, vector<2x256xf32>
    %c0_1 = arith.constant 0 : index
    %c0_2 = arith.constant 0 : index
    %c0_3 = arith.constant 0 : index
    %1 = vector.load %arg3[%c0_1, %c0_2, %c0_3] : memref<1x2x256xf32, #tpu.memory_space<vmem>>, vector<1x2x256xf32>
    %2 = vector.shape_cast %1 : vector<1x2x256xf32> to vector<2x256xf32>
    %3 = arith.addf %0, %2 : vector<2x256xf32>
    %4 = vector.extract_strided_slice %3 {offsets = [0, 0], sizes = [1, 256], strides = [1, 1]} : vector<2x256xf32> to vector<1x256xf32>
    %cst = arith.constant 1.500000e+01 : f32
    %5 = vector.broadcast %cst : f32 to vector<1x256xf32>
    %6 = arith.divf %4, %5 : vector<1x256xf32>
    %cst_4 = arith.constant 5.000000e-01 : f32
    %7 = vector.broadcast %cst_4 : f32 to vector<1x256xf32>
    %8 = arith.subf %6, %7 : vector<1x256xf32>
    %cst_5 = arith.constant 2.000000e+00 : f32
    %9 = vector.broadcast %cst_5 : f32 to vector<1x256xf32>
    %10 = arith.mulf %9, %8 : vector<1x256xf32>
    %11 = vector.extract_strided_slice %3 {offsets = [1, 0], sizes = [1, 256], strides = [1, 1]} : vector<2x256xf32> to vector<1x256xf32>
    %cst_6 = arith.constant 1.500000e+01 : f32
    %12 = vector.broadcast %cst_6 : f32 to vector<1x256xf32>
    %13 = arith.divf %11, %12 : vector<1x256xf32>
    %cst_7 = arith.constant 5.000000e-01 : f32
    %14 = vector.broadcast %cst_7 : f32 to vector<1x256xf32>
    %15 = arith.subf %13, %14 : vector<1x256xf32>
    %cst_8 = arith.constant 2.000000e+00 : f32
    %16 = vector.broadcast %cst_8 : f32 to vector<1x256xf32>
    %17 = arith.mulf %16, %15 : vector<1x256xf32>
    %cst_9 = arith.constant 1.000000e+00 : f32
    %18 = vector.broadcast %cst_9 : f32 to vector<1x256xf32>
    %19 = arith.addf %10, %18 : vector<1x256xf32>
    %cst_10 = arith.constant 1.600000e+01 : f32
    %20 = vector.broadcast %cst_10 : f32 to vector<1x256xf32>
    %21 = arith.mulf %19, %20 : vector<1x256xf32>
    %cst_11 = arith.constant 1.000000e+00 : f32
    %22 = vector.broadcast %cst_11 : f32 to vector<1x256xf32>
    %23 = arith.subf %21, %22 : vector<1x256xf32>
    %cst_12 = arith.constant 5.000000e-01 : f32
    %24 = vector.broadcast %cst_12 : f32 to vector<1x256xf32>
    %25 = arith.mulf %23, %24 : vector<1x256xf32>
    %cst_13 = arith.constant 1.000000e+00 : f32
    %26 = vector.broadcast %cst_13 : f32 to vector<1x256xf32>
    %27 = arith.addf %17, %26 : vector<1x256xf32>
    %cst_14 = arith.constant 1.600000e+01 : f32
    %28 = vector.broadcast %cst_14 : f32 to vector<1x256xf32>
    %29 = arith.mulf %27, %28 : vector<1x256xf32>
    %cst_15 = arith.constant 1.000000e+00 : f32
    %30 = vector.broadcast %cst_15 : f32 to vector<1x256xf32>
    %31 = arith.subf %29, %30 : vector<1x256xf32>
    %cst_16 = arith.constant 5.000000e-01 : f32
    %32 = vector.broadcast %cst_16 : f32 to vector<1x256xf32>
    %33 = arith.mulf %31, %32 : vector<1x256xf32>
    %34 = math.floor %25 : vector<1x256xf32>
    %35 = math.floor %33 : vector<1x256xf32>
    %36 = arith.subf %25, %34 : vector<1x256xf32>
    %37 = arith.subf %33, %35 : vector<1x256xf32>
    %cst_17 = arith.constant 1.000000e+00 : f32
    %38 = vector.broadcast %cst_17 : f32 to vector<1x256xf32>
    %39 = arith.subf %38, %36 : vector<1x256xf32>
    %cst_18 = arith.constant 1.000000e+00 : f32
    %40 = vector.broadcast %cst_18 : f32 to vector<1x256xf32>
    %41 = arith.subf %40, %37 : vector<1x256xf32>
    %42 = arith.fptosi %34 : vector<1x256xf32> to vector<1x256xi32>
    %43 = arith.fptosi %35 : vector<1x256xf32> to vector<1x256xi32>
    %c1_i32 = arith.constant 1 : i32
    %44 = vector.broadcast %c1_i32 : i32 to vector<1x256xi32>
    %45 = arith.addi %42, %44 : vector<1x256xi32>
    %c1_i32_19 = arith.constant 1 : i32
    %46 = vector.broadcast %c1_i32_19 : i32 to vector<1x256xi32>
    %47 = arith.addi %43, %46 : vector<1x256xi32>
    %48 = tpu.iota {dimensions = array<i32: 0>} : vector<16x256xi32>
    %49 = tpu.iota {dimensions = array<i32: 0>} : vector<16x256xi32>
    %50 = vector.broadcast %42 : vector<1x256xi32> to vector<16x256xi32>
    %51 = arith.cmpi eq, %48, %50 : vector<16x256xi32>
    %cst_20 = arith.constant 0.000000e+00 : f32
    %52 = vector.shape_cast %39 : vector<1x256xf32> to vector<1x256xf32>
    %53 = vector.broadcast %52 : vector<1x256xf32> to vector<16x256xf32>
    %54 = vector.broadcast %cst_20 : f32 to vector<16x256xf32>
    %55 = arith.select %51, %53, %54 : vector<16x256xi1>, vector<16x256xf32>
    %56 = vector.broadcast %45 : vector<1x256xi32> to vector<16x256xi32>
    %57 = arith.cmpi eq, %48, %56 : vector<16x256xi32>
    %cst_21 = arith.constant 0.000000e+00 : f32
    %58 = vector.shape_cast %36 : vector<1x256xf32> to vector<1x256xf32>
    %59 = vector.broadcast %58 : vector<1x256xf32> to vector<16x256xf32>
    %60 = vector.broadcast %cst_21 : f32 to vector<16x256xf32>
    %61 = arith.select %57, %59, %60 : vector<16x256xi1>, vector<16x256xf32>
    %62 = arith.addf %55, %61 : vector<16x256xf32>
    %63 = vector.broadcast %43 : vector<1x256xi32> to vector<16x256xi32>
    %64 = arith.cmpi eq, %49, %63 : vector<16x256xi32>
    %cst_22 = arith.constant 0.000000e+00 : f32
    %65 = vector.shape_cast %41 : vector<1x256xf32> to vector<1x256xf32>
    %66 = vector.broadcast %65 : vector<1x256xf32> to vector<16x256xf32>
    %67 = vector.broadcast %cst_22 : f32 to vector<16x256xf32>
    %68 = arith.select %64, %66, %67 : vector<16x256xi1>, vector<16x256xf32>
    %69 = vector.broadcast %47 : vector<1x256xi32> to vector<16x256xi32>
    %70 = arith.cmpi eq, %49, %69 : vector<16x256xi32>
    %cst_23 = arith.constant 0.000000e+00 : f32
    %71 = vector.shape_cast %37 : vector<1x256xf32> to vector<1x256xf32>
    %72 = vector.broadcast %71 : vector<1x256xf32> to vector<16x256xf32>
    %73 = vector.broadcast %cst_23 : f32 to vector<16x256xf32>
    %74 = arith.select %70, %72, %73 : vector<16x256xi1>, vector<16x256xf32>
    %75 = arith.addf %68, %74 : vector<16x256xf32>
    %c0_24 = arith.constant 0 : index
    %c0_25 = arith.constant 0 : index
    %c0_26 = arith.constant 0 : index
    %76 = vector.load %arg4[%c0_24, %c0_25, %c0_26] : memref<1x64x16xf32, #tpu.memory_space<vmem>>, vector<1x64x16xf32>
    %77 = vector.shape_cast %76 : vector<1x64x16xf32> to vector<64x16xf32>
    %cst_27 = arith.constant dense<0.000000e+00> : vector<64x256xf32>
    %78 = tpu.matmul %77, %62, %cst_27 {dimension_numbers = #tpu.dot_dimension_numbers<[1], [0], [0], [1], [0, 0, 1, 1], [], []>} : vector<64x16xf32>, vector<16x256xf32>, vector<64x256xf32> -> vector<64x256xf32>
    %79 = vector.shape_cast %78 : vector<64x256xf32> to vector<4x16x256xf32>
    %80 = vector.shape_cast %75 : vector<16x256xf32> to vector<1x16x256xf32>
    %81 = vector.broadcast %80 : vector<1x16x256xf32> to vector<4x16x256xf32>
    %82 = arith.mulf %79, %81 : vector<4x16x256xf32>
    %cst_28 = arith.constant dense<0.000000e+00> : vector<4x256xf32>
    %83 = vector.multi_reduction <add>, %82, %cst_28 [1] : vector<4x16x256xf32> to vector<4x256xf32>
    %84 = vector.shape_cast %83 : vector<4x256xf32> to vector<1x4x256xf32>
    %c0_29 = arith.constant 0 : index
    %c0_30 = arith.constant 0 : index
    %c0_31 = arith.constant 0 : index
    %85 = vector.load %arg5[%c0_29, %c0_30, %c0_31] : memref<1x4x256xf32, #tpu.memory_space<vmem>>, vector<1x4x256xf32>
    tpu.vector_store %arg5[%c0_29, %c0_30, %c0_31], %84 {strides = array<i32>} : memref<1x4x256xf32, #tpu.memory_space<vmem>>, vector<1x4x256xf32>,
    return
  }
  func.func @transform_0(%arg0: i32, %arg1: i32) -> (i32, i32) {
    %c0_i32 = arith.constant 0 : i32
    %c0_i32_0 = arith.constant 0 : i32
    return %c0_i32, %arg1 : i32, i32
  }
  func.func @transform_1(%arg0: i32, %arg1: i32) -> (i32, i32, i32) {
    %c0_i32 = arith.constant 0 : i32
    %c0_i32_0 = arith.constant 0 : i32
    return %arg0, %c0_i32, %arg1 : i32, i32, i32
  }
  func.func @transform_2(%arg0: i32, %arg1: i32) -> (i32, i32, i32) {
    %c0_i32 = arith.constant 0 : i32
    %c0_i32_0 = arith.constant 0 : i32
    %c0_i32_1 = arith.constant 0 : i32
    return %arg0, %c0_i32, %c0_i32_0 : i32, i32, i32
  }
  func.func @transform_3(%arg0: i32, %arg1: i32) -> (i32, i32, i32) {
    %c0_i32 = arith.constant 0 : i32
    %c0_i32_0 = arith.constant 0 : i32
    return %arg0, %c0_i32, %arg1 : i32, i32, i32
  }
}

</mosaic_0001>

<bundles_post_ra>
// kernel: tpu_custom_call.1
= control target key start
LH: loop header
LB: loop body
LE: loop exit
PB: predicated region body
PF: predicated region fallthrough
CT: control target
= control target key end

     0   :  { %8 = vsyncpa [#allocation3], 0  ;;  %s1190_s0 = inlined_call_operand.vmem [shape: f32[2,256], index: 0, kind: input, shape index: {}]   ;;  %s1191_s1 = inlined_call_operand.vmem [shape: f32[2,2,256], index: 1, kind: input, shape index: {}]   ;;  %s1192_s2 = inlined_call_operand.vmem [shape: f32[2,64,16], index: 2, kind: input, shape index: {}]   ;;  %s1193_s3 = inlined_call_operand.hbm [shape: f32[2,4,256], index: 3, kind: output, shape index: {}]  }
   0x1   :  { %10 = vsyncpa [#allocation3 + $0x1], 0  ;;  %s1001_s12 = smov 0   ;;  %s1003_s13 = smov 0  }
   0x2   :  { %s1005_s14 = smov 0   ;;  %s1007_s15 = smov 0  }
   0x3   :  { %s1009_s16 = smov 0   ;;  %s1011_s17 = smov 0  }
   0x4 LB: > { %s806_s18 = sadd.s32 4294967295, %s977_s17   ;;  %s807_s19 = sadd.s32 4294967294, %s977_s17   ;;  %s977_s17 = sphi %s1011_s17, %s16_s17   ;;  %s973_s16 = sphi %s1009_s16, %s1200_s16   ;;  %s969_s15 = sphi %s1007_s15, %s1199_s15   ;;  %s965_s14 = sphi %s1005_s14, %s1198_s14   ;;  %s961_s13 = sphi %s1003_s13, %s1197_s13   ;;  %s957_s12 = sphi %s1001_s12, %s1196_s12  }
   0x5   : > { %s28_s20 = sadd.s32 1, %s973_s16  ;;  %s117_s21 = sadd.s32 1, %s965_s14 }
   0x6   : > { %p30_p0 = scmp.ge.s32.totalorder %s28_s20, 2  ;;  %p127_p1 = scmp.ne.s32.totalorder %s965_s14, %s961_s13 }
   0x7   : > { %p128_p2 = scmp.eq.s32.totalorder %s806_s18, 1  ;;  %p133_p3 = scmp.ne.s32.totalorder %s961_s13, %s957_s12 }
   0x8   : > { %s1202_s20 = smov (%p30_p0, %s28_s20), 0  ;;  %p134_p5 = scmp.eq.s32.totalorder %s807_s19, 1 }
   0x9   : > { %p1041_p4 = por %p128_p2, %p127_p1  ;;  %s112_s23 = ssub.s32 %s973_s16, %s1202_s20 }
   0xa   : > { %p811_p6 = scmp.ge.s32.totalorder %s977_s17, 1  ;;  %p115_p7 = scmp.eq.s32.totalorder %s112_s23, 0 }
   0xb   : > { %p1048_p8 = por %p134_p5, %p133_p3  ;;  %p182_p9 = scmp.lt.s32.totalorder %s977_s17, 3 }
   0xc   : > { %s1054_s25 = scalar_select %p115_p7, %s965_s14, %s117_s21  }
   0xd   : > { %p183_p10 = pnand %p811_p6, %p182_p9 }
   0xe   : > { %p227_p11 = scmp.lt.s32.totalorder (!%p183_p10), %s969_s15, 1  ;;  %v979_v0 = vmov (!%p183_p10), 0.0   ;;  %v242_v1 = vld [vmem:[%s1190_s0] sm:$0xf] (!%p183_p10)  ;;  %v258_v8 = vlaneseq (!%p183_p10)  ;;  %vm447_vm8 = vcmask (!%p183_p10), 130048   ;;  %s217_s10 = sand.u32 (!%p183_p10), 1, %s961_s13  }
   0xf   : > { %186 = sbr.rel (%p183_p10) target bundleno = 330 (0x14a), region = 32  ;;  %536 = vmatprep.mubr.f32.mxu0 (!%p183_p10), %v979_v0  ;;  %560 = vmatprep.mubr.f32.mxu1 (!%p183_p10), %v979_v0  ;;  %s812_s11 = sshll.u32 (!%p183_p10), %s217_s10, 3 }
  0x10   : > { %v1069_v11 = vshrl.u32 (!%p183_p10), %v258_v8, 7  ;;  %s834_s18 = sshll.u32 (!%p183_p10), %s969_s15, 7  ;;  %s219_s19 = scalar_lea.vmem (!%p183_p10), [#allocation2], %s812_s11 }
  0x11   : > { %s703_s21 = sshll.u32 (!%p183_p10), %s219_s19, 4  ;;  %s980_s29 = smov (!%p183_p10), [#allocation2]   ;;  %s1145_s21 = int_to_ptr.vmem [resolvable:$true] %s703_s21 }
  0x12   : > { %v263_v14 = vsub.s32 (!%p183_p10), 0, %v1069_v11  ;;  %v267_v15 = vsub.s32 (!%p183_p10), 2, %v1069_v11  ;;  %v1086_v23 = vadd.s32 (!%p183_p10), 8, %v1069_v11  ;;  %v353_v60 = vsub.s32 (!%p183_p10), 1, %v1069_v11  ;;  %s899_s28 = scalar_lea.vmem (!%p183_p10), %s1145_s21, 128  ;;  %s903_s30 = sshll.u32 (!%p183_p10), %s980_s29, 4  ;;  %s904_s30 = int_to_ptr.vmem [resolvable:$false] %s903_s30 }
  0x13   : > { %v357_v61 = vsub.s32 (!%p183_p10), 3, %v1069_v11  ;;  %p900_p12 = scmp.ne.s32.totalorder (!%p183_p10), %s1145_s21, %s899_s28  ;;  %s905_s4 = scalar_lea.vmem (!%p183_p10), %s904_s30, 256 }
  0x14   : > { %p906_p1 = scmp.lt.s32.totalorder (!%p183_p10), %s1145_s21, %s904_s30  ;;  %p907_p2 = scmp.lt.s32.totalorder (!%p183_p10), %s905_s4, %s899_s28 }
  0x15   : > { %p901_p13 = pnand (!%p183_p10), %p900_p12, %p1041_p4 }
  0x16   : > { %s1060_s26 = scalar_select %p227_p11, %s969_s15, 1 }
  0x17   : > { %s687_s15 = scalar_lea.sflag [#allocation3], %s217_s10  ;;  %p902_p0 = pneg %p901_p13 }
  0x18   : > { %s832_s27 = sshll.u32 %s1060_s26, 2  ;;  %s833_s6 = sshll.u32 %s1060_s26, 6 }
  0x19   : > { %s234_s5 = scalar_lea.vmem %s1191_s1, %s832_s27  ;;  %s240_s9 = scalar_lea.vmem %s1192_s2, %s833_s6 }
  0x1a   : > { %v243_v2 = vld [vmem:[%s234_s5] sm:$0xf]  ;;  %v440_v54 = vld [vmem:[%s240_s9 + $0x8] sm:$0xff]  ;;  %v441_v56 = vld [vmem:[%s240_s9 + $0x10] sm:$0xff]  ;;  %s1143_s27 = scalar_lea.hbm %s1193_s3, %s834_s18  ;;  %p908_p3 = por %p907_p2, %p906_p1 }
  0x1b   : > { %v244_v3 = vadd.f32 %v243_v2, %v242_v1  ;;  %v439_v52 = vld [vmem:[%s240_s9] sm:$0xff]  ;;  %v444_v55 = vld [vmem:[%s240_s9 + $0x28] sm:$0xff]  ;;  %v445_v57 = vld [vmem:[%s240_s9 + $0x30] sm:$0xff] }
  0x1c   : > { %v443_v53 = vld [vmem:[%s240_s9 + $0x20] sm:$0xff]  ;;  %v442_v58 = vld [vmem:[%s240_s9 + $0x18] sm:$0xff]  ;;  %p909_p5 = pnand %p908_p3, %p902_p0 }
  0x1d   : > { %v246_v4 = vmul.f32 0.06666667, %v244_v3  ;;  %v446_v59 = vld [vmem:[%s240_s9 + $0x38] sm:$0xff] }
  0x1f   : > { %v817_v5 = vadd.f32 -0.5, %v246_v4 }
  0x21   : > { %v248_v6 = vmul.f32 2.0, %v817_v5 }
  0x23   : > { %v249_v7 = vadd.f32 1.0, %v248_v6 }
  0x25   : > { %v250_v9 = vmul.f32 16.0, %v249_v7 }
  0x27   : > { %v818_v10 = vadd.f32 -1.0, %v250_v9 }
  0x29   : > { %v252_v12 = vmul.f32 0.5, %v818_v10 }
  0x2b   : > { %v253_v13 = vfloor.f32 %v252_v12 }
  0x2d   : > { %v1073_v16 = vsub.f32 %v252_v12, %v253_v13  ;;  %v841_v17 = vtrunc.f32 %v253_v13 }
  0x2f   : > { %v1076_v18 = vsub.f32 1.0, %v1073_v16  ;;  %v1078_v19 = vcvt.f32.s32 %v841_v17  ;;  %v332_v20 = vrot.slane %v1073_v16, %v267_v15  ;;  %v328_v21 = vrot.slane %v1073_v16, %v263_v14 }
  0x30   : > { %v416_v5 = vrot.slane %v1073_v16, %v353_v60  ;;  %v420_v7 = vrot.slane %v1073_v16, %v357_v61 }
  0x31   : > { %v1083_v22 = vadd.s32 1, %v1078_v19  ;;  %v268_v24 = vrot.slane %v1078_v19, %v267_v15  ;;  %v289_v25 = vrot.slane %v1076_v18, %v267_v15  ;;  %v264_v26 = vrot.slane %v1078_v19, %v263_v14 }
  0x32   : > { %v285_v27 = vrot.slane %v1076_v18, %v263_v14  ;;  %v342_v32 = vrot.slane %v332_v20, %v263_v14  ;;  %v338_v35 = vrot.slane %v328_v21, %v263_v14  ;;  %v354_v62 = vrot.slane %v1078_v19, %v353_v60 }
  0x33   : > { %v276_v28 = vrot.slane %v268_v24, %v263_v14  ;;  %v299_v29 = vrot.slane %v289_v25, %v263_v14  ;;  %v311_v30 = vrot.slane %v1083_v22, %v267_v15  ;;  %v307_v31 = vrot.slane %v1083_v22, %v263_v14 }
  0x34   : > { %v272_v33 = vrot.slane %v264_v26, %v263_v14  ;;  %v295_v34 = vrot.slane %v285_v27, %v263_v14  ;;  %v396_v63 = vrot.slane %v1083_v22, %v353_v60  ;;  %v358_v1 = vrot.slane %v1078_v19, %v357_v61 }
  0x35   : > { %vm278_vm0 = vcmp.eq.s32.totalorder %v1069_v11, %v276_v28  ;;  %vm280_vm1 = vcmp.eq.s32.totalorder %v1086_v23, %v276_v28  ;;  %v319_v36 = vrot.slane %v311_v30, %v263_v14  ;;  %v315_v37 = vrot.slane %v307_v31, %v263_v14 }
  0x36   : > { %v301_v38 = vsel %vm278_vm0, %v299_v29, 0.0  ;;  %v303_v39 = vsel %vm280_vm1, %v299_v29, 0.0  ;;  %vm277_vm2 = vcmp.eq.s32.totalorder %v1069_v11, %v272_v33  ;;  %vm279_vm3 = vcmp.eq.s32.totalorder %v1086_v23, %v272_v33 }
  0x37   : > { %vm321_vm4 = vcmp.eq.s32.totalorder %v1069_v11, %v319_v36  ;;  %vm323_vm5 = vcmp.eq.s32.totalorder %v1086_v23, %v319_v36  ;;  %v300_v40 = vsel %vm277_vm2, %v295_v34, 0.0  ;;  %v302_v41 = vsel %vm279_vm3, %v295_v34, 0.0 }
  0x38   : > { %v344_v42 = vsel %vm321_vm4, %v342_v32, 0.0  ;;  %v346_v43 = vsel %vm323_vm5, %v342_v32, 0.0  ;;  %vm320_vm6 = vcmp.eq.s32.totalorder %v1069_v11, %v315_v37  ;;  %vm322_vm7 = vcmp.eq.s32.totalorder %v1086_v23, %v315_v37 }
  0x39   : > { %v348_v44 = vadd.f32 %v344_v42, %v301_v38  ;;  %v350_v45 = vadd.f32 %v346_v43, %v303_v39  ;;  %v343_v46 = vsel %vm320_vm6, %v338_v35, 0.0  ;;  %v345_v47 = vsel %vm322_vm7, %v338_v35, 0.0 }
  0x3a   : > { %v347_v48 = vadd.f32 %v343_v46, %v300_v40  ;;  %v349_v49 = vadd.f32 %v345_v47, %v302_v41  ;;  %v400_v2 = vrot.slane %v1083_v22, %v357_v61  ;;  %v362_v3 = vrot.slane %v354_v62, %v353_v60 }
  0x3b   : > { %v835_v50 = vpack.c.bf16 %v350_v45, %v348_v44  ;;  %v404_v4 = vrot.slane %v396_v63, %v353_v60  ;;  %v378_v6 = vrot.slane %v1076_v18, %v357_v61  ;;  %v366_v8 = vrot.slane %v358_v1, %v353_v60 }
  0x3c   : > { %v837_v51 = vpack.c.bf16 %v349_v49, %v347_v48  ;;  %v408_v9 = vrot.slane %v400_v2, %v353_v60  ;;  %vm367_vm9 = vcmp.eq.s32.totalorder %v1069_v11, %v362_v3  ;;  %v426_v12 = vrot.slane %v416_v5, %v353_v60 }
  0x3d   : > { %836 = vmatprep.subr.bf16.mxu0 %v835_v50  ;;  %839 = vmatprep.subr.bf16.mxu1 %v835_v50  ;;  %vm409_vm10 = vcmp.eq.s32.totalorder %v1069_v11, %v404_v4  ;;  %v388_v13 = vrot.slane %v378_v6, %v353_v60  ;;  %v430_v14 = vrot.slane %v420_v7, %v353_v60  ;;  %vm670_vm1 = vcmask 1041409  }
  0x3e   : > { %838 = vmatpush1.bf16.msra.mxu0 %v837_v51  ;;  %840 = vmatpush1.bf16.msra.mxu1 %v837_v51  ;;  %vm369_vm11 = vcmp.eq.s32.totalorder %v1086_v23, %v362_v3  ;;  %vm411_vm12 = vcmp.eq.s32.totalorder %v1086_v23, %v404_v4  ;;  %vm368_vm13 = vcmp.eq.s32.totalorder %v1069_v11, %v366_v8  ;;  %v431_v16 = vsel %vm409_vm10, %v426_v12, 0.0 }
  0x3f   : > { %vm410_vm14 = vcmp.eq.s32.totalorder %v1069_v11, %v408_v9  ;;  %vm370_vm15 = vcmp.eq.s32.totalorder %v1086_v23, %v366_v8  ;;  %vm412_vm0 = vcmp.eq.s32.totalorder %v1086_v23, %v408_v9  ;;  %v390_v19 = vsel %vm368_vm13, %v388_v13, 0.0 }
  0x40   : > { %v432_v20 = vsel %vm410_vm14, %v430_v14, 0.0  ;;  %v392_v21 = vsel %vm370_vm15, %v388_v13, 0.0  ;;  %v434_v22 = vsel %vm412_vm0, %v430_v14, 0.0  ;;  %vm672_vm2 = vcmask 1045509  }
  0x41   : > { %819 = vmatmul.mubr.msk.f32.vlgmr.msra.gmra.mrb[0].mxu0 %vm447_vm8, %v439_v52  ;;  %823 = vmatmul.mubr.msk.f32.vlgmr.msra.gmra.mrb[0].mxu1 %vm447_vm8, %v443_v53  ;;  %v436_v30 = vadd.f32 %v432_v20, %v390_v19  ;;  %v438_v11 = vadd.f32 %v434_v22, %v392_v21  ;;  %vm675_vm3 = vcmask 1042434   ;;  %vm677_vm4 = vcmask 1046534  }
  0x42   : > { %542 = vmatprep.mubr.f32.mxu0 %v979_v0  ;;  %566 = vmatprep.mubr.f32.mxu1 %v979_v0  ;;  %vm680_vm5 = vcmask 1043459   ;;  %vm682_vm6 = vcmask 1047559  }
  0x45   : > { %820 = vmatmul.mubr.msk.f32.gmra.mrb[2].mxu0 %vm447_vm8, %v440_v54  ;;  %824 = vmatmul.mubr.msk.f32.gmra.mrb[2].mxu1 %vm447_vm8, %v444_v55 }
  0x46   : > { %548 = vmatprep.mubr.f32.mxu0 %v979_v0  ;;  %572 = vmatprep.mubr.f32.mxu1 %v979_v0 }
  0x49   : > { %821 = vmatmul.mubr.msk.f32.gmra.mrb[4].mxu0 %vm447_vm8, %v441_v56  ;;  %825 = vmatmul.mubr.msk.f32.gmra.mrb[4].mxu1 %vm447_vm8, %v445_v57 }
  0x4a   : > { %554 = vmatprep.mubr.f32.mxu0 %v979_v0  ;;  %578 = vmatprep.mubr.f32.mxu1 %v979_v0  ;;  %v374_v0 = vrot.slane %v1076_v18, %v353_v60  ;;  %v433_v18 = vsel %vm411_vm12, %v426_v12, 0.0 }
  0x4c   : > { %v384_v10 = vrot.slane %v374_v0, %v353_v60 }
  0x4d   : > { %822 = vmatmul.mubr.msk.f32.gmra.mrb[6].mxu0 %vm447_vm8, %v442_v58  ;;  %826 = vmatmul.mubr.msk.f32.gmra.mrb[6].mxu1 %vm447_vm8, %v446_v59 }
  0x4e   : > { %v389_v15 = vsel %vm367_vm9, %v384_v10, 0.0  ;;  %v391_v17 = vsel %vm369_vm11, %v384_v10, 0.0 }
  0x4f   : > { %v435_v26 = vadd.f32 %v431_v16, %v389_v15  ;;  %v437_v29 = vadd.f32 %v433_v18, %v391_v17 }
 0x114   : > { %v538_v24 = vpop.f32.mrb[0].mxu0  ;;  %v562_v25 = vpop.f32.mrb[0].mxu1 }
 0x115   : > { %v540_v27 = vpop.f32.mrb[1].mxu0  ;;  %v564_v28 = vpop.f32.mrb[1].mxu1  ;;  %v593_v31 = vmul.f32 %v562_v25, %v435_v26  ;;  %v585_v34 = vmul.f32 %v538_v24, %v435_v26 }
 0x116   : > { %v594_v32 = vmul.f32 %v564_v28, %v436_v30  ;;  %v586_v39 = vmul.f32 %v540_v27, %v436_v30 }
 0x118   : > { %v544_v33 = vpop.f32.mrb[2].mxu0  ;;  %v568_v23 = vpop.f32.mrb[2].mxu1 }
 0x119   : > { %v587_v35 = vmul.f32 %v544_v33, %v437_v29  ;;  %v595_v36 = vmul.f32 %v568_v23, %v437_v29  ;;  %v546_v37 = vpop.f32.mrb[3].mxu0  ;;  %v570_v38 = vpop.f32.mrb[3].mxu1 }
 0x11a   : > { %v588_v40 = vmul.f32 %v546_v37, %v438_v11  ;;  %v596_v41 = vmul.f32 %v570_v38, %v438_v11 }
 0x11b   : > { %v601_v42 = vadd.f32 %v587_v35, %v585_v34  ;;  %v629_v43 = vadd.f32 %v595_v36, %v593_v31 }
 0x11c   : > { %v608_v44 = vadd.f32 %v588_v40, %v586_v39  ;;  %v636_v45 = vadd.f32 %v596_v41, %v594_v32  ;;  %v550_v46 = vpop.f32.mrb[4].mxu0  ;;  %v574_v47 = vpop.f32.mrb[4].mxu1 }
 0x11d   : > { %v602_v48 = vrot.slane %v601_v42, 4  ;;  %v630_v49 = vrot.slane %v629_v43, 4  ;;  %v552_v50 = vpop.f32.mrb[5].mxu0  ;;  %v576_v51 = vpop.f32.mrb[5].mxu1  ;;  %v589_v56 = vmul.f32 %v550_v46, %v435_v26  ;;  %v597_v57 = vmul.f32 %v574_v47, %v435_v26 }
 0x11e   : > { %v609_v52 = vrot.slane %v608_v44, 4  ;;  %v637_v53 = vrot.slane %v636_v45, 4  ;;  %v590_v60 = vmul.f32 %v552_v50, %v436_v30  ;;  %v598_v61 = vmul.f32 %v576_v51, %v436_v30 }
 0x11f   : > { %v603_v54 = vadd.f32 %v602_v48, %v601_v42  ;;  %v631_v55 = vadd.f32 %v630_v49, %v629_v43 }
 0x120   : > { %v610_v58 = vadd.f32 %v609_v52, %v608_v44  ;;  %v638_v59 = vadd.f32 %v637_v53, %v636_v45  ;;  %v556_v62 = vpop.f32.mrb[6].mxu0  ;;  %v580_v63 = vpop.f32.mrb[6].mxu1 }
 0x121   : > { %v604_v1 = vrot.slane %v603_v54, 2  ;;  %v632_v2 = vrot.slane %v631_v55, 2  ;;  %v591_v3 = vmul.f32 %v556_v62, %v437_v29  ;;  %v599_v0 = vmul.f32 %v580_v63, %v437_v29  ;;  %v558_v4 = vpop.f32.mrb[7].mxu0  ;;  %v582_v5 = vpop.f32.mrb[7].mxu1 }
 0x122   : > { %v611_v6 = vrot.slane %v610_v58, 2  ;;  %v639_v7 = vrot.slane %v638_v59, 2  ;;  %v592_v8 = vmul.f32 %v558_v4, %v438_v11  ;;  %v600_v9 = vmul.f32 %v582_v5, %v438_v11 }
 0x123   : > { %v605_v10 = vadd.f32 %v604_v1, %v603_v54  ;;  %v633_v12 = vadd.f32 %v632_v2, %v631_v55  ;;  %v615_v13 = vadd.f32 %v591_v3, %v589_v56  ;;  %v643_v14 = vadd.f32 %v599_v0, %v597_v57 }
 0x124   : > { %v612_v15 = vadd.f32 %v611_v6, %v610_v58  ;;  %v640_v16 = vadd.f32 %v639_v7, %v638_v59  ;;  %v622_v17 = vadd.f32 %v592_v8, %v590_v60  ;;  %v650_v18 = vadd.f32 %v600_v9, %v598_v61 }
 0x125   : > { %v606_v19 = vrot.slane %v605_v10, 1  ;;  %v634_v20 = vrot.slane %v633_v12, 1  ;;  %v616_v21 = vrot.slane %v615_v13, 4  ;;  %v644_v22 = vrot.slane %v643_v14, 4 }
 0x126   : > { %v613_v24 = vrot.slane %v612_v15, 1  ;;  %v641_v25 = vrot.slane %v640_v16, 1  ;;  %v623_v26 = vrot.slane %v622_v17, 4  ;;  %v651_v27 = vrot.slane %v650_v18, 4 }
 0x127   : > { %v607_v28 = vadd.f32 %v606_v19, %v605_v10  ;;  %v635_v29 = vadd.f32 %v634_v20, %v633_v12  ;;  %v617_v30 = vadd.f32 %v616_v21, %v615_v13  ;;  %v645_v11 = vadd.f32 %v644_v22, %v643_v14 }
 0x128   : > { %v614_v31 = vadd.f32 %v613_v24, %v612_v15  ;;  %v642_v32 = vadd.f32 %v641_v25, %v640_v16  ;;  %v624_v33 = vadd.f32 %v623_v26, %v622_v17  ;;  %v652_v23 = vadd.f32 %v651_v27, %v650_v18 }
 0x129   : > { %v618_v34 = vrot.slane %v617_v30, 2  ;;  %v646_v35 = vrot.slane %v645_v11, 2 }
 0x12a   : > { %v665_v36 = vcombine.low %v607_v28, %v614_v31  ;;  %v667_v37 = vcombine.low %v635_v29, %v642_v32  ;;  %v625_v38 = vrot.slane %v624_v33, 2  ;;  %v653_v39 = vrot.slane %v652_v23, 2 }
 0x12b   : > { %v619_v40 = vadd.f32 %v618_v34, %v617_v30  ;;  %v647_v41 = vadd.f32 %v646_v35, %v645_v11 }
 0x12c   : > { %v626_v42 = vadd.f32 %v625_v38, %v624_v33  ;;  %v654_v43 = vadd.f32 %v653_v39, %v652_v23  ;;  %v674_v55 = vrot.slane %v667_v37, 6 }
 0x12d   : > { %v620_v44 = vrot.slane %v619_v40, 1  ;;  %v648_v45 = vrot.slane %v647_v41, 1 }
 0x12e   : > { %v627_v46 = vrot.slane %v626_v42, 1  ;;  %v655_v47 = vrot.slane %v654_v43, 1 }
 0x12f   : > { %v621_v48 = vadd.f32 %v620_v44, %v619_v40  ;;  %v649_v49 = vadd.f32 %v648_v45, %v647_v41 }
 0x130   : > { %v628_v50 = vadd.f32 %v627_v46, %v626_v42  ;;  %v656_v51 = vadd.f32 %v655_v47, %v654_v43 }
 0x132   : > { %v666_v52 = vcombine.low %v621_v48, %v628_v50  ;;  %v668_v53 = vcombine.low %v649_v49, %v656_v51 }
 0x134   : > { %v669_v54 = vrot.slane %v666_v52, 7  ;;  %v679_v59 = vrot.slane %v668_v53, 5 }
 0x136   : > { %v671_v56 = vsel %vm670_vm1, %v669_v54, %v665_v36 }
 0x137   : > { %v673_v57 = vsel %vm672_vm2, %v669_v54, %v671_v56 }
 0x138   : > { %v676_v58 = vsel %vm675_vm3, %v674_v55, %v673_v57 }
 0x139   : > { %v678_v60 = vsel %vm677_vm4, %v674_v55, %v676_v58 }
 0x13a   : > { %v681_v61 = vsel %vm680_vm5, %v679_v59, %v678_v60 }
 0x13b   : > { %v683_v62 = vsel %vm682_vm6, %v679_v59, %v681_v61 }
 0x13c   : > { %685 = vst [vmem:[%s219_s19] sm:$0xff] %v683_v62 }
 0x13d   : > { %912 = shalt.err (!%p909_p5)
}
 0x13e   : > { %s913_s5 = scalar_lea.hbm %s1143_s27, 128  ;;  %s917_s8 = scalar_lea.hbm %s1193_s3, 256 }
 0x13f   : > { %p914_p6 = scmp.ne.s32.totalorder %s1143_s27, %s913_s5  ;;  %p918_p10 = scmp.lt.u32.totalorder %s1143_s27, %s1193_s3 }
 0x140   : > { %p919_p11 = scmp.lt.u32.totalorder %s917_s8, %s913_s5  ;;  %p921_p13 = scmp.lt.u32.totalorder %s913_s5, %s1143_s27 }
 0x141   : > { %p915_p7 = pnand %p914_p6, %p1041_p4 }
 0x142   : > { %p920_p12 = por %p919_p11, %p918_p10 }
 0x143   : > { %p916_p9 = pneg %p915_p7 }
 0x144   : > { %p922_p0 = por %p921_p13, %p920_p12 }
 0x146   : > { %p923_p1 = pnand %p922_p0, %p916_p9 }
 0x148   : > { %926 = shalt.err (!%p923_p1)
}
 0x149   : > { %843 = dma.vmem_to_hbm [thread:$0]  (%p1041_p4), %s1145_s21, 128, %s1143_s27, %s687_s15  }
 0x14a PF: > { %p849_p2 = scmp.ge.s32.totalorder %s977_s17, 2  ;;  %s715_s11 = sand.u32 1, %s957_s12  }
 0x14b   : > { %s716_s18 = scalar_lea.sflag [#allocation3], %s715_s11 }
 0x14c   : > { %p846_p3 = pnand %p849_p2, %p1048_p8 }
 0x14e   : > { %952 = dma.done.wait (!%p846_p3), %s716_s18, 128  }
 0x14f   : > { %954 = vsyncadd (!%p846_p3), %s716_s18, 4294967168  ;;  %s16_s17 = sadd.s32 1, %s977_s17   ;;  %s1196_s12 = smov %s961_s13 }
 0x150   : > { %p13_p5 = scmp.ge.s32.totalorder %s16_s17, 4   ;;  %s1197_s13 = smov %s965_s14 }
 0x151   : > { %s1198_s14 = smov %s1054_s25  ;;  %s1199_s15 = smov %s973_s16 }
 0x152   : > { %s1200_s16 = smov %s1202_s20  ;;  %15 = sbr.rel (!%p13_p5) target bundleno = 4 (0x4), region = 73 }
 0x159   :  { %721 = vsyncpa [#allocation3], 1 }
 0x15a   :  { %723 = vsyncpa [#allocation3 + $0x1], 1 }

</bundles_post_ra>
